<compile_context>
chip_gen: v7x
topology: tpu7x:2x2x1
jax: 0.10.0
libtpu: 0.0.40
codegen_flags: <defaults>
</compile_context>

<pallas_src>
import functools

import jax
import jax.numpy as jnp
from jax.experimental import pallas as pl
from jax.experimental.pallas import tpu as pltpu

_LANE = 128                    # TPU vreg lane width
_TILE_BUDGET_BYTES = 3 << 20   # per pipeline buffer, counted in x.dtype bytes
_MIN_GRID_STEPS = 8            # keep the pipeline + both v7x TCs fed
_VMEM_LIMIT_FLOOR = 32 << 20   # never lower the v6e/v7x scoped default
_VMEM_LIMIT_CAP = 45 << 20     # stay well inside v7x's 64 MiB physical VMEM


def _choose_lane_tile(B, C, L, itemsize):
    """Pick the lane-tile width TL for the (1, C, TL) block."""
    if L < _LANE:
        # Full-extent block (always legal). The wrapper folds B into the lane
        # axis before reaching here, so this only triggers for tiny B*L.
        return L
    # Dtype-aware byte budget; no artificial lane cap beyond the budget.
    max_by_budget = max(
        _LANE, ((_TILE_BUDGET_BYTES // (itemsize * C)) // _LANE) * _LANE)
    tl = max(_LANE, min(max_by_budget, (L // _LANE) * _LANE))
    # Keep the grid long enough to feed double-buffering and both v7x cores.
    if B * pl.cdiv(L, tl) < _MIN_GRID_STEPS:
        steps_needed = pl.cdiv(_MIN_GRID_STEPS, B)
        tl = max(_LANE, min(tl, ((L // steps_needed) // _LANE) * _LANE))
    # Prefer a TL that divides L evenly (no ragged masked edge tile), but only
    # if that does not shrink the tile by more than 2x.
    for cand in range(tl, _LANE - 1, -_LANE):
        if L % cand == 0:
            if 2 * cand >= tl:
                return cand
            break
    # Ragged last tile is correct: out-of-bounds garbage stays in its own lane
    # columns (reduction is over C, the sublane axis) and is masked on store.
    return tl


def _layernorm_kernel(x_ref, g_ref, b_ref, o_ref, *, eps):
    # x_ref: (1, C, TL) tile; g_ref / b_ref: (1, C, 1)
    x = x_ref[...].astype(jnp.float32)
    mean = jnp.mean(x, axis=1, keepdims=True)           # (1, 1, TL) XLU reduce
    xc = x - mean                                       # computed once, reused
    var = jnp.mean(xc * xc, axis=1, keepdims=True)      # biased (unbiased=False)
    inv = jax.lax.rsqrt(var + eps)                      # EUP rsqrt (free slot)
    g = g_ref[...].astype(jnp.float32)
    b = b_ref[...].astype(jnp.float32)
    o_ref[...] = (xc * inv * g + b).astype(o_ref.dtype)


def _layer_norm_ncl(x, g, b, eps):
    B, C, L = x.shape
    itemsize = jnp.dtype(x.dtype).itemsize
    tl = _choose_lane_tile(B, C, L, itemsize)
    grid = (B, pl.cdiv(L, tl))

    # Scoped-VMEM sizing: double-buffered input + output tiles plus the f32
    # intermediates of the kernel body, with a small margin.
    tile_elems = C * tl
    pipeline_bytes = 4 * tile_elems * itemsize          # 2 bufs x (in + out)
    body_bytes = 3 * tile_elems * 4                     # f32 x, xc, result
    vmem_limit = int(min(max(pipeline_bytes + body_bytes + (2 << 20),
                             _VMEM_LIMIT_FLOOR), _VMEM_LIMIT_CAP))
    # TODO(synk): if C is so large that a single (1, C, 128) tile blows past
    # this cap (C >~ 13K in f32), restructure with a C-grid "arbitrary"
    # reduction axis plus mean / E[x^2] scratch accumulators instead.

    n = B * C * L
    cost = pl.CostEstimate(
        flops=8 * n,
        transcendentals=B * L,
        bytes_accessed=2 * n * itemsize + 2 * C * jnp.dtype(g.dtype).itemsize,
    )

    kernel = functools.partial(_layernorm_kernel, eps=float(eps))
    return pl.pallas_call(
        kernel,
        out_shape=jax.ShapeDtypeStruct((B, C, L), x.dtype),
        grid_spec=pltpu.PrefetchScalarGridSpec(
            num_scalar_prefetch=0,
            grid=grid,
            in_specs=[
                pl.BlockSpec((1, C, tl), lambda i, j: (i, 0, j)),   # x tile
                pl.BlockSpec((1, C, 1), lambda i, j: (0, 0, 0)),    # g (bcast)
                pl.BlockSpec((1, C, 1), lambda i, j: (0, 0, 0)),    # b (bcast)
            ],
            out_specs=pl.BlockSpec((1, C, tl), lambda i, j: (i, 0, j)),
        ),
        compiler_params=pltpu.CompilerParams(
            # Both axes independent -> shard across v7x's 2 TensorCores.
            dimension_semantics=("parallel", "parallel"),
            vmem_limit_bytes=vmem_limit,
        ),
        cost_estimate=cost,
    )(x, g, b)


def layer_norm(x, g, b, *, eps=1e-5):
    """x: (B, C, L); g, b: (1, C, 1). Returns (B, C, L) in x.dtype."""
    B, C, L = x.shape
    assert g.shape == (1, C, 1) and b.shape == (1, C, 1)
    if L < _LANE and B > 1:
        # Tiny-L path: fold the batch into the lane axis so the output is as
        # lane-dense as possible (avoids masked vst / strided HBM rows).
        # Costs two wrapper-side transpose passes; per-(b, l) normalization
        # over C is unchanged by the fold.
        xf = jnp.transpose(x, (1, 0, 2)).reshape(1, C, B * L)
        out = _layer_norm_ncl(xf, g, b, eps)
        return jnp.transpose(out.reshape(C, B, L), (1, 0, 2))
    return _layer_norm_ncl(x, g, b, eps)


def _reference(x, g, b, eps):
    x = x.astype(jnp.float32)
    g = g.astype(jnp.float32)
    b = b.astype(jnp.float32)
    mean = jnp.mean(x, axis=1, keepdims=True)
    var = jnp.mean((x - mean) ** 2, axis=1, keepdims=True)
    return (x - mean) / jnp.sqrt(var + eps) * g + b


if __name__ == "__main__":
    key = jax.random.PRNGKey(0)
    eps = 1e-5
    k1, k2, k3 = jax.random.split(key, 3)

    # 1) Small demo shape consistent with the module's (1, dim, 1) params
    #    (exercises the batch-folded tiny-L path).
    B, C, L = 2, 4, 16
    x = jax.random.normal(k1, (B, C, L), dtype=jnp.float32)
    g = jnp.ones((1, C, 1), dtype=jnp.float32)   # nn.Parameter(ones)
    b = jnp.zeros((1, C, 1), dtype=jnp.float32)  # nn.Parameter(zeros)
    out = jax.block_until_ready(layer_norm(x, g, b, eps=eps))
    assert jnp.allclose(out, _reference(x, g, b, eps), atol=1e-4, rtol=1e-4), \
        "mismatch vs reference (tiny-L folded path)"

    # 2) Lane-dense, L-tiled fast path (L >= 128), non-trivial affine params.
    B2, C2, L2 = 2, 8, 256
    x2 = jax.random.normal(k2, (B2, C2, L2), dtype=jnp.float32)
    g2 = jax.random.normal(k3, (1, C2, 1), dtype=jnp.float32)
    b2 = jnp.full((1, C2, 1), 0.1, dtype=jnp.float32)
    out2 = jax.block_until_ready(layer_norm(x2, g2, b2, eps=eps))
    assert jnp.allclose(out2, _reference(x2, g2, b2, eps),
                        atol=1e-4, rtol=1e-4), \
        "mismatch vs reference (lane-tiled path)"

    # 3) bf16 input exercises the dtype-aware tile sizing; looser tolerance.
    x3 = x2.astype(jnp.bfloat16)
    g3 = g2.astype(jnp.bfloat16)
    b3 = b2.astype(jnp.bfloat16)
    out3 = jax.block_until_ready(layer_norm(x3, g3, b3, eps=eps))
    assert jnp.allclose(out3.astype(jnp.float32), _reference(x3, g3, b3, eps),
                        atol=3e-2, rtol=3e-2), \
        "mismatch vs reference (bf16 path)"

    print("KERNEL_OK")
</pallas_src>

<mosaic_0001>
module attributes {stable_mosaic.version = 11 : i64} {
  func.func @_layernorm_kernel(%arg0: i32, %arg1: i32, %arg2: memref<1x4x32xf32, #tpu.memory_space<vmem>>, %arg3: memref<1x4x1xf32, #tpu.memory_space<vmem>>, %arg4: memref<1x4x1xf32, #tpu.memory_space<vmem>>, %arg5: memref<1x4x32xf32, #tpu.memory_space<vmem>>) attributes {dimension_semantics = [#tpu.dimension_semantics<parallel>, #tpu.dimension_semantics<parallel>], iteration_bounds = array<i64: 1, 1>, scalar_prefetch = 0 : i64, scratch_operands = 0 : i64, tpu.core_type = #tpu.core_type<tc>, window_params = [{transform_indices = @transform_0, window_bounds = array<i64: 1, 4, 32>}, {pipeline_mode = #tpu.pipeline_mode<synchronous>, transform_indices = @transform_1, window_bounds = array<i64: 1, 4, 1>}, {pipeline_mode = #tpu.pipeline_mode<synchronous>, transform_indices = @transform_2, window_bounds = array<i64: 1, 4, 1>}, {transform_indices = @transform_3, window_bounds = array<i64: 1, 4, 32>}]} {
    %c0 = arith.constant 0 : index
    %c0_0 = arith.constant 0 : index
    %c0_1 = arith.constant 0 : index
    %0 = vector.load %arg2[%c0, %c0_0, %c0_1] : memref<1x4x32xf32, #tpu.memory_space<vmem>>, vector<1x4x32xf32>
    %cst = arith.constant dense<0.000000e+00> : vector<1x32xf32>
    %1 = vector.multi_reduction <add>, %0, %cst [1] : vector<1x4x32xf32> to vector<1x32xf32>
    %2 = vector.shape_cast %1 : vector<1x32xf32> to vector<1x1x32xf32>
    %cst_2 = arith.constant 4.000000e+00 : f32
    %3 = vector.broadcast %cst_2 : f32 to vector<1x1x32xf32>
    %4 = arith.divf %2, %3 : vector<1x1x32xf32>
    %5 = vector.broadcast %4 : vector<1x1x32xf32> to vector<1x4x32xf32>
    %6 = arith.subf %0, %5 : vector<1x4x32xf32>
    %7 = arith.mulf %6, %6 : vector<1x4x32xf32>
    %cst_3 = arith.constant dense<0.000000e+00> : vector<1x32xf32>
    %8 = vector.multi_reduction <add>, %7, %cst_3 [1] : vector<1x4x32xf32> to vector<1x32xf32>
    %9 = vector.shape_cast %8 : vector<1x32xf32> to vector<1x1x32xf32>
    %cst_4 = arith.constant 4.000000e+00 : f32
    %10 = vector.broadcast %cst_4 : f32 to vector<1x1x32xf32>
    %11 = arith.divf %9, %10 : vector<1x1x32xf32>
    %cst_5 = arith.constant 9.99999974E-6 : f32
    %12 = vector.broadcast %cst_5 : f32 to vector<1x1x32xf32>
    %13 = arith.addf %11, %12 : vector<1x1x32xf32>
    %14 = math.rsqrt %13 : vector<1x1x32xf32>
    %c0_6 = arith.constant 0 : index
    %c0_7 = arith.constant 0 : index
    %c0_8 = arith.constant 0 : index
    %15 = vector.load %arg3[%c0_6, %c0_7, %c0_8] : memref<1x4x1xf32, #tpu.memory_space<vmem>>, vector<1x4x1xf32>
    %c0_9 = arith.constant 0 : index
    %c0_10 = arith.constant 0 : index
    %c0_11 = arith.constant 0 : index
    %16 = vector.load %arg4[%c0_9, %c0_10, %c0_11] : memref<1x4x1xf32, #tpu.memory_space<vmem>>, vector<1x4x1xf32>
    %17 = vector.broadcast %14 : vector<1x1x32xf32> to vector<1x4x32xf32>
    %18 = arith.mulf %6, %17 : vector<1x4x32xf32>
    %19 = vector.broadcast %15 : vector<1x4x1xf32> to vector<1x4x32xf32>
    %20 = arith.mulf %18, %19 : vector<1x4x32xf32>
    %21 = vector.broadcast %16 : vector<1x4x1xf32> to vector<1x4x32xf32>
    %22 = arith.addf %20, %21 : vector<1x4x32xf32>
    %c0_12 = arith.constant 0 : index
    %c0_13 = arith.constant 0 : index
    %c0_14 = arith.constant 0 : index
    %23 = vector.load %arg5[%c0_12, %c0_13, %c0_14] : memref<1x4x32xf32, #tpu.memory_space<vmem>>, vector<1x4x32xf32>
    tpu.vector_store %arg5[%c0_12, %c0_13, %c0_14], %22 {strides = array<i32>} : memref<1x4x32xf32, #tpu.memory_space<vmem>>, vector<1x4x32xf32>,
    return
  }
  func.func @transform_0(%arg0: i32, %arg1: i32) -> (i32, i32, i32) {
    %c0_i32 = arith.constant 0 : i32
    %c0_i32_0 = arith.constant 0 : i32
    return %arg0, %c0_i32, %arg1 : i32, i32, i32
  }
  func.func @transform_1(%arg0: i32, %arg1: i32) -> (i32, i32, i32) {
    %c0_i32 = arith.constant 0 : i32
    %c0_i32_0 = arith.constant 0 : i32
    %c0_i32_1 = arith.constant 0 : i32
    %c0_i32_2 = arith.constant 0 : i32
    return %c0_i32, %c0_i32_0, %c0_i32_1 : i32, i32, i32
  }
  func.func @transform_2(%arg0: i32, %arg1: i32) -> (i32, i32, i32) {
    %c0_i32 = arith.constant 0 : i32
    %c0_i32_0 = arith.constant 0 : i32
    %c0_i32_1 = arith.constant 0 : i32
    %c0_i32_2 = arith.constant 0 : i32
    return %c0_i32, %c0_i32_0, %c0_i32_1 : i32, i32, i32
  }
  func.func @transform_3(%arg0: i32, %arg1: i32) -> (i32, i32, i32) {
    %c0_i32 = arith.constant 0 : i32
    %c0_i32_0 = arith.constant 0 : i32
    return %arg0, %c0_i32, %arg1 : i32, i32, i32
  }
}

</mosaic_0001>

<bundles_post_ra>
// kernel: tpu_custom_call.1
= control target key start
LH: loop header
LB: loop body
LE: loop exit
PB: predicated region body
PF: predicated region fallthrough
CT: control target
= control target key end

     0   :  { %v97_v1 = vmov 0   ;;  %s143_s0 = inlined_call_operand.vmem [shape: f32[1,4,32], index: 0, kind: input, shape index: {}]   ;;  %s144_s1 = inlined_call_operand.vmem [shape: f32[1,4,1], index: 1, kind: input, shape index: {}]   ;;  %s145_s2 = inlined_call_operand.vmem [shape: f32[1,4,1], index: 2, kind: input, shape index: {}]   ;;  %s146_s3 = inlined_call_operand.hbm [shape: f32[1,4,32], index: 3, kind: output, shape index: {}]  }
   0x1   :  { %v38_v0 = vld [vmem:[%s144_s1] sm:$0xf]  ;;  %70 = vset.pattern.permute.xlu0 %v97_v1 }
   0x2   :  { %8 = vsyncpa [#allocation3], 0  ;;  %43 = vperm.xlu0 %70, %v38_v0   ;;  %v39_v2 = vld [vmem:[%s145_s2] sm:$0xf]  ;;  %vm16_vm0 = vcmask 257024  }
   0x3   :  { %v15_v3 = vld [vmem:[%s143_s0] sm:$0xf]  ;;  %s98_s0 = smov [#allocation2]  }
   0x4   :  { %v17_v4 = vsel %vm16_vm0, %v15_v3, 0.0  ;;  %s60_s1 = sshll.u32 %s98_s0, 4  ;;  %s61_s1 = int_to_ptr.vmem [resolvable:$true] %s60_s1 }
   0x5   :  { %v18_v5 = vrot.slane %v17_v4, 4  ;;  %s73_s2 = scalar_lea.vmem %s61_s1, 64  ;;  %p78_p1 = scmp.lt.s32.totalorder %s61_s1, %s61_s1 }
   0x6   :  { %49 = vperm.xlu0 %70, %v39_v2   ;;  %p74_p0 = scmp.ne.s32.totalorder %s61_s1, %s73_s2  ;;  %p79_p2 = scmp.lt.s32.totalorder %s73_s2, %s73_s2 }
   0x7   :  { %v19_v6 = vadd.f32 %v18_v5, %v17_v4 }
   0x8   :  { %p80_p3 = por %p79_p2, %p78_p1 }
   0x9   :  { %v20_v7 = vrot.slane %v19_v6, 2 }
   0xa   :  { %p81_p4 = pnand %p80_p3, %p74_p0 }
   0xb   :  { %v21_v8 = vadd.f32 %v20_v7, %v19_v6 }
   0xd   :  { %v22_v9 = vrot.slane %v21_v8, 1 }
   0xf   :  { %v23_v10 = vadd.f32 %v22_v9, %v21_v8 }
  0x11   :  { %v25_v11 = vmul.f32 0.25, %v23_v10 }
  0x13   :  { %v26_v12 = vsub.f32 %v15_v3, %v25_v11 }
  0x15   :  { %v27_v13 = vmul.f32 %v26_v12, %v26_v12 }
  0x17   :  { %v28_v14 = vsel %vm16_vm0, %v27_v13, 0.0 }
  0x18   :  { %v29_v15 = vrot.slane %v28_v14, 4 }
  0x1a   :  { %v30_v16 = vadd.f32 %v29_v15, %v28_v14 }
  0x1c   :  { %v31_v17 = vrot.slane %v30_v16, 2 }
  0x1e   :  { %v32_v18 = vadd.f32 %v31_v17, %v30_v16 }
  0x20   :  { %v33_v19 = vrot.slane %v32_v18, 1 }
  0x22   :  { %v34_v20 = vadd.f32 %v33_v19, %v32_v18 }
  0x24   :  { %v35_v21 = vmul.f32 0.25, %v34_v20 }
  0x26   :  { %v36_v22 = vadd.f32 1e-05, %v35_v21 }
  0x28   :  { %71 = vrsqrt.f32 %v36_v22 }
  0x32   :  { %v72_v23 = vpop.eup %71 }
  0x33   :  { %v40_v24 = vmul.f32 %v72_v23, %v26_v12 }
  0x81   :  { %v44_v25 = vpop.permute.xlu0 %43 }
  0x82   :  { %v46_v26 = vmul.f32 %v44_v25, %v40_v24 }
  0x85   :  { %v50_v27 = vpop.permute.xlu0 %49 }
  0x86   :  { %v52_v28 = vadd.f32 %v50_v27, %v46_v26 }
  0x88   :  { %53 = vst.msk [vmem:[#allocation2] sm:$0xf] %vm16_vm0, %v52_v28 }
  0x89   :  { %84 = shalt.err (!%p81_p4)
}
  0x8a   :  { %s85_s20 = scalar_lea.hbm %s146_s3, 64 }
  0x8b   :  { %p86_p5 = scmp.ne.s32.totalorder %s146_s3, %s85_s20  ;;  %p89_p6 = scmp.lt.u32.totalorder %s85_s20, %s146_s3 }
  0x8d   :  { %p91_p7 = pnand %p89_p6, %p86_p5 }
  0x8f   :  { %94 = shalt.err (!%p91_p7)
}
  0x90   :  { %63 = dma.vmem_to_hbm [thread:$0]  %s61_s1, 64, %s146_s3, [#allocation3]  }
  0x91   :  { %95 = dma.done.wait [#allocation3], 64  }
  0x92   :  { %96 = vsyncadd [#allocation3], 4294967232 }
  0x93   :  { %67 = vsyncpa [#allocation3], 1 }

</bundles_post_ra>
